<compile_context>
chip_gen: v5e
topology: v5e:2x2
jax: 0.10.0
libtpu: 0.0.40
codegen_flags: <defaults>
</compile_context>

<pallas_src>
import functools

import jax
import jax.numpy as jnp
from jax.experimental import pallas as pl
from jax.experimental.pallas import tpu as pltpu

_LANE = 128          # TPU lane width (last-dim tiling)
_SUBLANE_BF16 = 16   # bf16 sublane packing for the second-to-last dim


def _round_up(x, m):
    return ((x + m - 1) // m) * m


def _policy_kernel(ob_ref, w1_ref, b1_ref, w2_ref, b2_ref, logp_ref):
    # Hidden layer: relu(ob @ w1 + b1).
    # ob/w1 are bf16 (halves the dominant HBM read stream); MXU accumulates f32.
    h = jnp.dot(ob_ref[...], w1_ref[...],
                preferred_element_type=jnp.float32) + b1_ref[...]
    h = jnp.maximum(h, 0.0)                                   # VPU, f32

    # Output layer: logits = h @ w2 + b2.  A is padded to 128 lanes; padded
    # lanes have zero weights and a -1e30 bias so exp() underflows to 0.
    logits = jnp.dot(h, w2_ref[...],
                     preferred_element_type=jnp.float32) + b2_ref[...]

    # Categorical normalization: log_probs = logits - logsumexp(logits, -1).
    m = jnp.max(logits, axis=-1, keepdims=True)
    lse = m + jnp.log(jnp.sum(jnp.exp(logits - m), axis=-1, keepdims=True))
    logp_ref[...] = logits - lse


@functools.partial(jax.jit, static_argnames=("tile_b",))
def discrete_policy_forward(ob, w1, b1, w2, b2, *, tile_b=512):
    """Fused forward pass of DiscretePolicy.

    Args:
      ob: [B, D] float32 observations.
      w1: [D, 32], b1: [1, 32], w2: [32, A], b2: [1, A].
      tile_b: batch rows per grid step (clamped / rounded for small B).

    Returns:
      log_probs [B, A] of the Categorical distribution
      (== torch.distributions.Categorical(logits=x).logits, which is normalized).
    """
    B, D = ob.shape
    H = w1.shape[1]
    A = w2.shape[1]

    # Tile/pad sizes: batch rows to a multiple of the (bf16) sublane count,
    # action lanes to a full 128-lane vreg row.
    tile_b = max(_SUBLANE_BF16, min(tile_b, _round_up(B, _SUBLANE_BF16)))
    b_pad = _round_up(B, tile_b)
    a_pad = _round_up(A, _LANE)

    # Pad & cast.  Only the ob stream scales with B -> bf16; tiny weights/biases
    # of the second layer stay f32 for accuracy (no bandwidth cost).
    ob_p = jnp.pad(ob, ((0, b_pad - B), (0, 0))).astype(jnp.bfloat16)
    w1_b = w1.astype(jnp.bfloat16)
    b1_f = b1.astype(jnp.float32)
    w2_p = jnp.pad(w2.astype(jnp.float32), ((0, 0), (0, a_pad - A)))
    b2_p = jnp.pad(b2.astype(jnp.float32), ((0, 0), (0, a_pad - A)),
                   constant_values=-1e30)   # padded action lanes -> exp() == 0

    grid = (b_pad // tile_b,)

    logp_padded = pl.pallas_call(
        _policy_kernel,
        out_shape=jax.ShapeDtypeStruct((b_pad, a_pad), jnp.float32),
        grid_spec=pltpu.PrefetchScalarGridSpec(
            num_scalar_prefetch=0,
            grid=grid,
            in_specs=[
                # Pipelined per-step observation tile.
                pl.BlockSpec((tile_b, D), lambda i: (i, 0)),
                # Weights/biases: constant index_map -> resident in VMEM,
                # no per-step DMA.
                pl.BlockSpec((D, H), lambda i: (0, 0)),
                pl.BlockSpec((1, H), lambda i: (0, 0)),
                pl.BlockSpec((H, a_pad), lambda i: (0, 0)),
                pl.BlockSpec((1, a_pad), lambda i: (0, 0)),
            ],
            out_specs=pl.BlockSpec((tile_b, a_pad), lambda i: (i, 0)),
        ),
        compiler_params=pltpu.CompilerParams(
            # Batch tiles are independent: shard across TCs on v7x (no-op on
            # single-TC v5e/v6e).
            dimension_semantics=("parallel",),
            # Explicit, v7x-safe (64 MiB physical) budget; per-step buffers are
            # only ~0.5 MiB double-buffered at tile_b=512.
            vmem_limit_bytes=32 * 1024 * 1024,
        ),
    )(ob_p, w1_b, b1_f, w2_p, b2_p)

    return logp_padded[:B, :A]


def init_params(key, input_dim, n_actions, hidden=32):
    """Deterministic synthetic init matching nn.Linear shapes (transposed)."""
    k1, k2, k3, k4 = jax.random.split(key, 4)
    # PyTorch nn.Linear uses U(-1/sqrt(fan_in), 1/sqrt(fan_in)); mimic that.
    lim1 = 1.0 / jnp.sqrt(jnp.float32(input_dim))
    lim2 = 1.0 / jnp.sqrt(jnp.float32(hidden))
    w1 = jax.random.uniform(k1, (input_dim, hidden), jnp.float32, -lim1, lim1)
    b1 = jax.random.uniform(k2, (1, hidden), jnp.float32, -lim1, lim1)
    w2 = jax.random.uniform(k3, (hidden, n_actions), jnp.float32, -lim2, lim2)
    b2 = jax.random.uniform(k4, (1, n_actions), jnp.float32, -lim2, lim2)
    return w1, b1, w2, b2


def _reference_log_probs(ob, w1, b1, w2, b2):
    """Plain-JAX reference with the same bf16 rounding on the first matmul."""
    h = jnp.maximum(
        jnp.dot(ob.astype(jnp.bfloat16), w1.astype(jnp.bfloat16),
                preferred_element_type=jnp.float32) + b1, 0.0)
    logits = jnp.dot(h, w2, preferred_element_type=jnp.float32) + b2
    return logits - jax.scipy.special.logsumexp(logits, axis=-1, keepdims=True)


if __name__ == "__main__":
    key = jax.random.PRNGKey(0)
    k_ob, k_params, k_ob_big = jax.random.split(key, 3)

    # Flappy-bird-like: small obs dim, 2 actions.
    B, D, A = 8, 8, 2
    ob = jax.random.normal(k_ob, (B, D), jnp.float32)
    w1, b1, w2, b2 = init_params(k_params, D, A)

    log_probs = discrete_policy_forward(ob, w1, b1, w2, b2)
    jax.block_until_ready(log_probs)

    logp_ref = _reference_log_probs(ob, w1, b1, w2, b2)
    assert log_probs.shape == (B, A)
    assert jnp.allclose(log_probs, logp_ref, atol=1e-2, rtol=1e-2)
    # probabilities sum to 1 (valid Categorical)
    assert jnp.allclose(jnp.sum(jnp.exp(log_probs), axis=-1), 1.0, atol=1e-5)

    # Exercise the pipelined batch grid (multiple steps + batch padding).
    B_big = 1024 + 40   # deliberately not a multiple of the tile
    ob_big = jax.random.normal(k_ob_big, (B_big, D), jnp.float32)
    logp_big = discrete_policy_forward(ob_big, w1, b1, w2, b2, tile_b=512)
    jax.block_until_ready(logp_big)
    logp_big_ref = _reference_log_probs(ob_big, w1, b1, w2, b2)
    assert logp_big.shape == (B_big, A)
    assert jnp.allclose(logp_big, logp_big_ref, atol=1e-2, rtol=1e-2)
    assert jnp.allclose(jnp.sum(jnp.exp(logp_big), axis=-1), 1.0, atol=1e-5)

    print("KERNEL_OK")
</pallas_src>

<mosaic_0001>
module attributes {stable_mosaic.version = 11 : i64} {
  func.func @_policy_kernel(%arg0: i32, %arg1: memref<16x8xbf16, #tpu.memory_space<vmem>>, %arg2: memref<8x32xbf16, #tpu.memory_space<vmem>>, %arg3: memref<1x32xf32, #tpu.memory_space<vmem>>, %arg4: memref<32x128xf32, #tpu.memory_space<vmem>>, %arg5: memref<1x128xf32, #tpu.memory_space<vmem>>, %arg6: memref<16x128xf32, #tpu.memory_space<vmem>>) attributes {dimension_semantics = [#tpu.dimension_semantics<parallel>], iteration_bounds = array<i64: 1>, scalar_prefetch = 0 : i64, scratch_operands = 0 : i64, tpu.core_type = #tpu.core_type<tc>, window_params = [{transform_indices = @transform_0, window_bounds = array<i64: 16, 8>}, {pipeline_mode = #tpu.pipeline_mode<synchronous>, transform_indices = @transform_1, window_bounds = array<i64: 8, 32>}, {pipeline_mode = #tpu.pipeline_mode<synchronous>, transform_indices = @transform_2, window_bounds = array<i64: 1, 32>}, {pipeline_mode = #tpu.pipeline_mode<synchronous>, transform_indices = @transform_3, window_bounds = array<i64: 32, 128>}, {pipeline_mode = #tpu.pipeline_mode<synchronous>, transform_indices = @transform_4, window_bounds = array<i64: 1, 128>}, {transform_indices = @transform_5, window_bounds = array<i64: 16, 128>}]} {
    %c0 = arith.constant 0 : index
    %c0_0 = arith.constant 0 : index
    %0 = vector.load %arg1[%c0, %c0_0] : memref<16x8xbf16, #tpu.memory_space<vmem>>, vector<16x8xbf16>
    %c0_1 = arith.constant 0 : index
    %c0_2 = arith.constant 0 : index
    %1 = vector.load %arg2[%c0_1, %c0_2] : memref<8x32xbf16, #tpu.memory_space<vmem>>, vector<8x32xbf16>
    %cst = arith.constant dense<0.000000e+00> : vector<16x32xf32>
    %2 = tpu.matmul %0, %1, %cst {dimension_numbers = #tpu.dot_dimension_numbers<[1], [0], [0], [1], [0, 0, 1, 1], [], []>} : vector<16x8xbf16>, vector<8x32xbf16>, vector<16x32xf32> -> vector<16x32xf32>
    %c0_3 = arith.constant 0 : index
    %c0_4 = arith.constant 0 : index
    %3 = vector.load %arg3[%c0_3, %c0_4] : memref<1x32xf32, #tpu.memory_space<vmem>>, vector<1x32xf32>
    %4 = vector.broadcast %3 : vector<1x32xf32> to vector<16x32xf32>
    %5 = arith.addf %2, %4 : vector<16x32xf32>
    %cst_5 = arith.constant 0.000000e+00 : f32
    %6 = vector.broadcast %cst_5 : f32 to vector<16x32xf32>
    %7 = arith.maximumf %5, %6 : vector<16x32xf32>
    %c0_6 = arith.constant 0 : index
    %c0_7 = arith.constant 0 : index
    %8 = vector.load %arg4[%c0_6, %c0_7] : memref<32x128xf32, #tpu.memory_space<vmem>>, vector<32x128xf32>
    %cst_8 = arith.constant dense<0.000000e+00> : vector<16x128xf32>
    %9 = tpu.matmul %7, %8, %cst_8 {dimension_numbers = #tpu.dot_dimension_numbers<[1], [0], [0], [1], [0, 0, 1, 1], [], []>} : vector<16x32xf32>, vector<32x128xf32>, vector<16x128xf32> -> vector<16x128xf32>
    %c0_9 = arith.constant 0 : index
    %c0_10 = arith.constant 0 : index
    %10 = vector.load %arg5[%c0_9, %c0_10] : memref<1x128xf32, #tpu.memory_space<vmem>>, vector<1x128xf32>
    %11 = vector.broadcast %10 : vector<1x128xf32> to vector<16x128xf32>
    %12 = arith.addf %9, %11 : vector<16x128xf32>
    %cst_11 = arith.constant dense<0xFF800000> : vector<16xf32>
    %13 = vector.multi_reduction <maximumf>, %12, %cst_11 [1] : vector<16x128xf32> to vector<16xf32>
    %14 = vector.shape_cast %13 : vector<16xf32> to vector<16x1xf32>
    %15 = vector.broadcast %14 : vector<16x1xf32> to vector<16x128xf32>
    %16 = arith.subf %12, %15 : vector<16x128xf32>
    %17 = math.exp %16 : vector<16x128xf32>
    %cst_12 = arith.constant dense<0.000000e+00> : vector<16xf32>
    %18 = vector.multi_reduction <add>, %17, %cst_12 [1] : vector<16x128xf32> to vector<16xf32>
    %19 = vector.shape_cast %18 : vector<16xf32> to vector<16x1xf32>
    %20 = math.log %19 : vector<16x1xf32>
    %21 = arith.addf %14, %20 : vector<16x1xf32>
    %22 = vector.broadcast %21 : vector<16x1xf32> to vector<16x128xf32>
    %23 = arith.subf %12, %22 : vector<16x128xf32>
    %c0_13 = arith.constant 0 : index
    %c0_14 = arith.constant 0 : index
    %24 = vector.load %arg6[%c0_13, %c0_14] : memref<16x128xf32, #tpu.memory_space<vmem>>, vector<16x128xf32>
    tpu.vector_store %arg6[%c0_13, %c0_14], %23 {strides = array<i32>} : memref<16x128xf32, #tpu.memory_space<vmem>>, vector<16x128xf32>,
    return
  }
  func.func @transform_0(%arg0: i32) -> (i32, i32) {
    %c0_i32 = arith.constant 0 : i32
    %c0_i32_0 = arith.constant 0 : i32
    return %arg0, %c0_i32 : i32, i32
  }
  func.func @transform_1(%arg0: i32) -> (i32, i32) {
    %c0_i32 = arith.constant 0 : i32
    %c0_i32_0 = arith.constant 0 : i32
    %c0_i32_1 = arith.constant 0 : i32
    return %c0_i32, %c0_i32_0 : i32, i32
  }
  func.func @transform_2(%arg0: i32) -> (i32, i32) {
    %c0_i32 = arith.constant 0 : i32
    %c0_i32_0 = arith.constant 0 : i32
    %c0_i32_1 = arith.constant 0 : i32
    return %c0_i32, %c0_i32_0 : i32, i32
  }
  func.func @transform_3(%arg0: i32) -> (i32, i32) {
    %c0_i32 = arith.constant 0 : i32
    %c0_i32_0 = arith.constant 0 : i32
    %c0_i32_1 = arith.constant 0 : i32
    return %c0_i32, %c0_i32_0 : i32, i32
  }
  func.func @transform_4(%arg0: i32) -> (i32, i32) {
    %c0_i32 = arith.constant 0 : i32
    %c0_i32_0 = arith.constant 0 : i32
    %c0_i32_1 = arith.constant 0 : i32
    return %c0_i32, %c0_i32_0 : i32, i32
  }
  func.func @transform_5(%arg0: i32) -> (i32, i32) {
    %c0_i32 = arith.constant 0 : i32
    %c0_i32_0 = arith.constant 0 : i32
    return %arg0, %c0_i32 : i32, i32
  }
}

</mosaic_0001>

<bundles_post_ra>
// kernel: discrete_policy_forward.1
= control target key start
LH: loop header
LB: loop body
LE: loop exit
PB: predicated region body
PF: predicated region fallthrough
CT: control target
= control target key end

     0   :  { %vm37_vm0 = vcmask 1043456   ;;  %vm33_vm1 = vcmask 64512   ;;  %vm65_vm2 = vcmask 261120   ;;  %s205_s1 = inlined_call_operand.vmem [shape: bf16[8,32], index: 1, kind: input, shape index: {}]   ;;  %s206_s0 = inlined_call_operand.vmem [shape: bf16[16,8], index: 0, kind: input, shape index: {}]   ;;  %s207_s3 = inlined_call_operand.vmem [shape: f32[32,128], index: 3, kind: input, shape index: {}]   ;;  %s208_s2 = inlined_call_operand.vmem [shape: f32[1,32], index: 2, kind: input, shape index: {}]   ;;  %s209_s4 = inlined_call_operand.vmem [shape: f32[1,128], index: 4, kind: input, shape index: {}]   ;;  %s210_s5 = inlined_call_operand.vmem [shape: f32[16,128], index: 5, kind: output, shape index: {}]  }
   0x1   :  { %v23_v0 = vld [vmem:[%s205_s1] sm:$0xf]  ;;  %v60_v1 = vld [vmem:[%s207_s3 + $0x18] sm:$0xff]  ;;  %v59_v4 = vld [vmem:[%s207_s3 + $0x10] sm:$0xff] }
   0x2   :  { %v39_v2 = vsel %vm37_vm0, %v23_v0, 0  ;;  %v130_v3 = vld [vmem:[%s206_s0] sm:$0xff]  ;;  %84 = vmatpush.msra.mxu1 %v60_v1  ;;  %131 = vmatpush.msra.mxu2 %v60_v1  ;;  %v58_v5 = vld [vmem:[%s207_s3 + $0x8] sm:$0xff] }
   0x3   :  { %48 = vmatpush.bf16.msra.mxu0 %v39_v2  ;;  %v57_v6 = vld [vmem:[%s207_s3] sm:$0xff] }
   0x4   :  { %85 = vmatpush.msra.mxu1 %v59_v4  ;;  %132 = vmatpush.msra.mxu2 %v59_v4  ;;  %v135_v7 = vld [vmem:[%s208_s2] ss:$0 sm:$0xff] }
   0x5   :  { %v136_v14 = vld [vmem:[%s209_s4] ss:$0 sm:$0xff] }
   0x6   :  { %127 = vmatmul.msk.bf16.vlgmr.msra.gmra.mxu0 %vm33_vm1, %v130_v3  ;;  %86 = vmatpush.msra.mxu1 %v58_v5 }
   0x7   :  { %133 = vmatpush.msra.mxu2 %v58_v5 }
   0x8   :  { %87 = vmatpush.msra.mxu1 %v57_v6 }
   0x9   :  { %134 = vmatpush.msra.mxu2 %v57_v6 }
  0x83   :  { %v50_v8 = vpop.f32.mrf.mxu0 }
  0x84   :  { %v51_v9 = vadd.f32 %v135_v7, %v50_v8 }
  0x86   :  { %v55_v10 = vmax.f32 %v51_v9, 0.0 }
  0x88   :  { %128 = vmatmul.msk.f32.vlgmr.msra.gmra.mxu1 %vm65_vm2, %v55_v10 }
  0x8b   :  { %v52_v11 = vpop.f32.mrf.mxu0 }
  0x8c   :  { %v53_v12 = vadd.f32 %v135_v7, %v52_v11 }
  0x8e   :  { %v56_v13 = vmax.f32 %v53_v12, 0.0 }
  0x90   :  { %129 = vmatmul.msk.f32.vlgmr.msra.gmra.mxu2 %vm65_vm2, %v56_v13 }
 0x105   :  { %v89_v15 = vpop.f32.mrf.mxu1 }
 0x106   :  { %v90_v16 = vadd.f32 %v136_v14, %v89_v15 }
 0x108   :  { %95 = vmax.xlane.f32.xlu0 %v90_v16 }
 0x113   :  { %v92_v17 = vpop.f32.mrf.mxu2 }
 0x114   :  { %v93_v18 = vadd.f32 %v136_v14, %v92_v17 }
 0x116   :  { %97 = vmax.xlane.f32.xlu0 %v93_v18 }
 0x17b   :  { %v96_v19 = vpop.xlane.xlu0 %95 }
 0x17c   :  { %v99_v20 = vsub.f32 %v90_v16, %v96_v19 }
 0x17e   :  { %v101_v21 = vmul.f32 1.442695, %v99_v20 }
 0x180   :  { %137 = vpow2.f32 %v101_v21 }
 0x186   :  { %v138_v22 = vpop.eup %137 }
 0x187   :  { %105 = vadd.xlane.f32.xlu1 %v138_v22 }
 0x189   :  { %v98_v23 = vpop.xlane.xlu0 %97 }
 0x18a   :  { %v100_v24 = vsub.f32 %v93_v18, %v98_v23 }
 0x18c   :  { %v103_v25 = vmul.f32 1.442695, %v100_v24 }
 0x18e   :  { %139 = vpow2.f32 %v103_v25 }
 0x194   :  { %v140_v26 = vpop.eup %139 }
 0x195   :  { %107 = vadd.xlane.f32.xlu1 %v140_v26 }
 0x1fa   :  { %v106_v27 = vpop.xlane.xlu1 %105 }
 0x1fb   :  { %141 = vlog2.f32 %v106_v27 }
 0x201   :  { %v142_v28 = vpop.eup %141 }
 0x202   :  { %v110_v29 = vmul.f32 0.6931472, %v142_v28 }
 0x204   :  { %v113_v30 = vadd.f32 %v110_v29, %v96_v19 }
 0x206   :  { %v115_v31 = vsub.f32 %v90_v16, %v113_v30 }
 0x208   :  { %117 = vst [vmem:[%s210_s5] sm:$0xff] %v115_v31  ;;  %v108_v32 = vpop.xlane.xlu1 %107 }
 0x209   :  { %143 = vlog2.f32 %v108_v32 }
 0x20f   :  { %v144_v33 = vpop.eup %143 }
 0x210   :  { %v112_v34 = vmul.f32 0.6931472, %v144_v33 }
 0x212   :  { %v114_v35 = vadd.f32 %v112_v34, %v98_v23 }
 0x214   :  { %v116_v36 = vsub.f32 %v93_v18, %v114_v35 }
 0x216   :  { %118 = vst [vmem:[%s210_s5 + $0x8] sm:$0xff] %v116_v36 }

</bundles_post_ra>
